<compile_context>
chip_gen: v7x
topology: tpu7x:2x2x1
jax: 0.10.0
libtpu: 0.0.40
codegen_flags: <defaults>
</compile_context>

<pallas_src>
import jax
import jax.numpy as jnp
from jax.experimental import pallas as pl
from jax.experimental.pallas import tpu as pltpu


def prepare_attention_params(params, num_heads, compute_dtype=jnp.bfloat16):
    """One-time parameter re-layout, hoisted out of the per-call path.

    PyTorch Linear weight is (C_out, C_in); y = x @ W.T.  Weights are split per
    head, the softmax scale is folded into Wq, and MXU operands are cast to bf16
    (accumulation stays f32 inside the kernel).
    """
    C = params["wq"].shape[0]
    assert C % num_heads == 0
    D = C // num_heads
    scale = D ** (-0.5)

    def split_in_heads(w):  # (C_out, C_in) -> (H, C_in, D)
        return w.T.reshape(C, num_heads, D).transpose(1, 0, 2)

    return {
        "wq_h": (split_in_heads(params["wq"]) * scale).astype(compute_dtype),  # scale folded
        "wk_h": split_in_heads(params["wk"]).astype(compute_dtype),
        "wv_h": split_in_heads(params["wv"]).astype(compute_dtype),
        "wp_h": params["wp"].T.reshape(num_heads, D, C).astype(compute_dtype),
        "bp": params["bp"].reshape(1, C).astype(jnp.float32),
    }


def _make_attention_kernel(num_heads, nq, nk, batch_block):
    def kernel(q_ref, k_ref, wq_ref, wk_ref, wv_ref, wp_ref, bp_ref, o_ref):
        # q_ref: (batch_block*Nq, C), k_ref: (batch_block*Nk, C) -- one batch block.
        compute_dtype = wq_ref.dtype                      # bf16
        mq, c = q_ref.shape
        mk = k_ref.shape[0]
        h = num_heads

        # Cast activations to bf16 *before* any broadcast (halves vreg/VMEM cost).
        xq = q_ref[...].astype(compute_dtype)             # (Bt*Nq, C)
        xk = k_ref[...].astype(compute_dtype)             # (Bt*Nk, C)

        # Head-batched q/k/v projections over ALL rows of the batch block at once:
        # (H, Bt*N, C) @ (H, C, D) -> (H, Bt*N, D), bf16 MXU operands, f32 acc.
        # The leading-dim broadcast is tiny in bf16 at these shapes; at production
        # shapes restructure per the flash TODO instead.
        xq_h = jnp.broadcast_to(xq[None], (h, mq, c))
        xk_h = jnp.broadcast_to(xk[None], (h, mk, c))
        q = jnp.einsum("hmc,hcd->hmd", xq_h, wq_ref[...],
                       preferred_element_type=jnp.float32).astype(compute_dtype)
        k = jnp.einsum("hmc,hcd->hmd", xk_h, wk_ref[...],
                       preferred_element_type=jnp.float32).astype(compute_dtype)
        v = jnp.einsum("hmc,hcd->hmd", xk_h, wv_ref[...],
                       preferred_element_type=jnp.float32).astype(compute_dtype)

        wp = wp_ref[...]                                   # (H, D, C) bf16
        bp = bp_ref[...]                                   # (1, C) f32

        # Attention core per batch element (static unrolled loop; batch_block is a
        # compile-time constant and attention must not mix batch elements).
        for b in range(batch_block):
            qb = q[:, b * nq:(b + 1) * nq, :]              # (H, Nq, D) bf16, pre-scaled
            kb = k[:, b * nk:(b + 1) * nk, :]              # (H, Nk, D) bf16
            vb = v[:, b * nk:(b + 1) * nk, :]              # (H, Nk, D) bf16

            # scale already folded into Wq -> no elementwise multiply here.
            s = jnp.einsum("hqd,hkd->hqk", qb, kb,
                           preferred_element_type=jnp.float32)     # (H, Nq, Nk) f32
            s_max = jnp.max(s, axis=-1, keepdims=True)
            p = jnp.exp(s - s_max)
            denom = jnp.sum(p, axis=-1, keepdims=True)
            p = (p * pl.reciprocal(denom, approx=True)).astype(compute_dtype)
            # attn_drop: identity (p=0.0 / eval mode)

            ctx = jnp.einsum("hqk,hkd->hqd", p, vb,
                             preferred_element_type=jnp.float32).astype(compute_dtype)

            # Output projection with the head merge folded into f32 accumulation:
            #   proj(concat_h ctx_h) == sum_h ctx_h @ Wp_h
            acc = jnp.dot(ctx[0], wp[0], preferred_element_type=jnp.float32)
            for hh in range(1, h):
                acc = acc + jnp.dot(ctx[hh], wp[hh],
                                    preferred_element_type=jnp.float32)
            out_b = acc + bp                               # bias added once, f32
            # proj_drop: identity (p=0.0 / eval mode)
            o_ref[b * nq:(b + 1) * nq, :] = out_b.astype(o_ref.dtype)

    return kernel


def attention_pallas(query, key, prepared, num_heads, batch_block=None):
    """query: (B, Nq, C), key: (B, Nk, C). `prepared` from prepare_attention_params.
    Returns (B, Nq, C)."""
    B, Nq, C = query.shape
    _, Nk, _ = key.shape
    assert C % num_heads == 0
    head_dim = C // num_heads

    if batch_block is None:
        # Largest divisor of B that is <= 8 (all of B at toy sizes).
        batch_block = next(bb for bb in range(min(B, 8), 0, -1) if B % bb == 0)
    assert B % batch_block == 0
    n_blocks = B // batch_block

    # Flatten batch/seq so each grid step reads/writes one dense 2-D slab
    # (bigger DMAs, larger matmul M).  Pure XLA-side reshapes, no copies in-kernel.
    q2d = query.reshape(B * Nq, C)
    k2d = key.reshape(B * Nk, C)

    kernel = _make_attention_kernel(num_heads, Nq, Nk, batch_block)

    out2d = pl.pallas_call(
        kernel,
        out_shape=jax.ShapeDtypeStruct((B * Nq, C), query.dtype),
        grid_spec=pltpu.PrefetchScalarGridSpec(
            num_scalar_prefetch=0,
            grid=(n_blocks,),
            in_specs=[
                pl.BlockSpec((batch_block * Nq, C), lambda i: (i, 0)),            # query rows
                pl.BlockSpec((batch_block * Nk, C), lambda i: (i, 0)),            # key rows
                pl.BlockSpec((num_heads, C, head_dim), lambda i: (0, 0, 0)),      # Wq (scaled, bf16)
                pl.BlockSpec((num_heads, C, head_dim), lambda i: (0, 0, 0)),      # Wk
                pl.BlockSpec((num_heads, C, head_dim), lambda i: (0, 0, 0)),      # Wv
                pl.BlockSpec((num_heads, head_dim, C), lambda i: (0, 0, 0)),      # Wp
                pl.BlockSpec((1, C), lambda i: (0, 0)),                           # proj bias
            ],
            out_specs=pl.BlockSpec((batch_block * Nq, C), lambda i: (i, 0)),
        ),
        compiler_params=pltpu.CompilerParams(
            # Batch-block axis shards across TensorCores on v7x.  For production,
            # pick batch_block so the grid gives each core >= 2 steps (pipelining).
            dimension_semantics=("parallel",),
            # 32 MiB is safe on v5e/v6e/v7x; raise on v5e/v6e for production tiles.
            vmem_limit_bytes=32 * 1024 * 1024,
        ),
    )(q2d, k2d, prepared["wq_h"], prepared["wk_h"], prepared["wv_h"],
      prepared["wp_h"], prepared["bp"])
    return out2d.reshape(B, Nq, C)


def attention_ref(query, key, params, num_heads):
    """Pure-JAX f32 reference mirroring the PyTorch forward (uses raw params)."""
    B, Nq, C = query.shape
    _, Nk, _ = key.shape
    D = C // num_heads
    scale = D ** (-0.5)

    q = query @ params["wq"].T
    k = key @ params["wk"].T
    v = key @ params["wv"].T

    q = q.reshape(B, Nq, num_heads, D).transpose(0, 2, 1, 3)
    k = k.reshape(B, Nk, num_heads, D).transpose(0, 2, 1, 3)
    v = v.reshape(B, Nk, num_heads, D).transpose(0, 2, 1, 3)

    attn = jnp.einsum("bhqd,bhkd->bhqk", q, k) * scale
    attn = jax.nn.softmax(attn, axis=-1)
    x = jnp.einsum("bhqk,bhkd->bhqd", attn, v)
    x = x.transpose(0, 2, 1, 3).reshape(B, Nq, C)
    x = x @ params["wp"].T + params["bp"]
    return x


if __name__ == "__main__":
    # Small shapes consistent with the module's forward.
    B, Nq, Nk, C, H = 2, 8, 8, 32, 4   # dim=32, num_heads=4 -> head_dim=8

    key0 = jax.random.PRNGKey(0)
    ks = jax.random.split(key0, 7)

    # Deterministic synthetic parameters (PyTorch Linear weight layout: (out, in)).
    params = {
        "wq": jax.random.normal(ks[0], (C, C), jnp.float32) * 0.05,
        "wk": jax.random.normal(ks[1], (C, C), jnp.float32) * 0.05,
        "wv": jax.random.normal(ks[2], (C, C), jnp.float32) * 0.05,
        "wp": jax.random.normal(ks[3], (C, C), jnp.float32) * 0.05,
        "bp": jax.random.normal(ks[4], (C,), jnp.float32) * 0.05,
    }

    query = jax.random.normal(ks[5], (B, Nq, C), jnp.float32)
    key_in = jax.random.normal(ks[6], (B, Nk, C), jnp.float32)

    # One-time weight re-layout (hoisted out of the call path).
    prepared = prepare_attention_params(params, num_heads=H)

    out = attention_pallas(query, key_in, prepared, num_heads=H)
    out = jax.block_until_ready(out)

    ref = attention_ref(query, key_in, params, num_heads=H)
    assert out.shape == (B, Nq, C)
    # bf16 MXU operands + approx softmax reciprocal vs the f32 reference:
    # tolerance widened deliberately (~1e-2 level expected drift).
    assert jnp.allclose(out, ref, atol=2e-2, rtol=2e-2), "mismatch vs reference"

    print("KERNEL_OK")
</pallas_src>

<mosaic_0001>
module attributes {stable_mosaic.version = 11 : i64} {
  func.func @kernel(%arg0: i32, %arg1: memref<16x32xf32, #tpu.memory_space<vmem>>, %arg2: memref<16x32xf32, #tpu.memory_space<vmem>>, %arg3: memref<4x32x8xbf16, #tpu.memory_space<vmem>>, %arg4: memref<4x32x8xbf16, #tpu.memory_space<vmem>>, %arg5: memref<4x32x8xbf16, #tpu.memory_space<vmem>>, %arg6: memref<4x8x32xbf16, #tpu.memory_space<vmem>>, %arg7: memref<1x32xf32, #tpu.memory_space<vmem>>, %arg8: memref<16x32xf32, #tpu.memory_space<vmem>>) attributes {dimension_semantics = [#tpu.dimension_semantics<parallel>], iteration_bounds = array<i64: 1>, scalar_prefetch = 0 : i64, scratch_operands = 0 : i64, tpu.core_type = #tpu.core_type<tc>, window_params = [{transform_indices = @transform_0, window_bounds = array<i64: 16, 32>}, {transform_indices = @transform_1, window_bounds = array<i64: 16, 32>}, {pipeline_mode = #tpu.pipeline_mode<synchronous>, transform_indices = @transform_2, window_bounds = array<i64: 4, 32, 8>}, {pipeline_mode = #tpu.pipeline_mode<synchronous>, transform_indices = @transform_3, window_bounds = array<i64: 4, 32, 8>}, {pipeline_mode = #tpu.pipeline_mode<synchronous>, transform_indices = @transform_4, window_bounds = array<i64: 4, 32, 8>}, {pipeline_mode = #tpu.pipeline_mode<synchronous>, transform_indices = @transform_5, window_bounds = array<i64: 4, 8, 32>}, {pipeline_mode = #tpu.pipeline_mode<synchronous>, transform_indices = @transform_6, window_bounds = array<i64: 1, 32>}, {transform_indices = @transform_7, window_bounds = array<i64: 16, 32>}]} {
    %c0 = arith.constant 0 : index
    %c0_0 = arith.constant 0 : index
    %0 = vector.load %arg1[%c0, %c0_0] : memref<16x32xf32, #tpu.memory_space<vmem>>, vector<16x32xf32>
    %1 = arith.truncf %0 : vector<16x32xf32> to vector<16x32xbf16>
    %c0_1 = arith.constant 0 : index
    %c0_2 = arith.constant 0 : index
    %2 = vector.load %arg2[%c0_1, %c0_2] : memref<16x32xf32, #tpu.memory_space<vmem>>, vector<16x32xf32>
    %3 = arith.truncf %2 : vector<16x32xf32> to vector<16x32xbf16>
    %4 = vector.shape_cast %1 : vector<16x32xbf16> to vector<1x16x32xbf16>
    %5 = vector.shape_cast %4 : vector<1x16x32xbf16> to vector<1x16x32xbf16>
    %6 = vector.broadcast %5 : vector<1x16x32xbf16> to vector<4x16x32xbf16>
    %7 = vector.shape_cast %3 : vector<16x32xbf16> to vector<1x16x32xbf16>
    %8 = vector.shape_cast %7 : vector<1x16x32xbf16> to vector<1x16x32xbf16>
    %9 = vector.broadcast %8 : vector<1x16x32xbf16> to vector<4x16x32xbf16>
    %c0_3 = arith.constant 0 : index
    %c0_4 = arith.constant 0 : index
    %c0_5 = arith.constant 0 : index
    %10 = vector.load %arg3[%c0_3, %c0_4, %c0_5] : memref<4x32x8xbf16, #tpu.memory_space<vmem>>, vector<4x32x8xbf16>
    "tpu.trace_start"() <{level = 10 : i32, message = "hmc,hcd->hmd"}> : () -> ()
    %cst = arith.constant dense<0.000000e+00> : vector<4x16x8xf32>
    %11 = tpu.matmul %6, %10, %cst {dimension_numbers = #tpu.dot_dimension_numbers<[2], [1], [1], [2], [0, 0, 0, 1, 1, 2], [0], [0]>} : vector<4x16x32xbf16>, vector<4x32x8xbf16>, vector<4x16x8xf32> -> vector<4x16x8xf32>
    "tpu.trace_stop"() : () -> ()
    %12 = arith.truncf %11 : vector<4x16x8xf32> to vector<4x16x8xbf16>
    %c0_6 = arith.constant 0 : index
    %c0_7 = arith.constant 0 : index
    %c0_8 = arith.constant 0 : index
    %13 = vector.load %arg4[%c0_6, %c0_7, %c0_8] : memref<4x32x8xbf16, #tpu.memory_space<vmem>>, vector<4x32x8xbf16>
    "tpu.trace_start"() <{level = 10 : i32, message = "hmc,hcd->hmd"}> : () -> ()
    %cst_9 = arith.constant dense<0.000000e+00> : vector<4x16x8xf32>
    %14 = tpu.matmul %9, %13, %cst_9 {dimension_numbers = #tpu.dot_dimension_numbers<[2], [1], [1], [2], [0, 0, 0, 1, 1, 2], [0], [0]>} : vector<4x16x32xbf16>, vector<4x32x8xbf16>, vector<4x16x8xf32> -> vector<4x16x8xf32>
    "tpu.trace_stop"() : () -> ()
    %15 = arith.truncf %14 : vector<4x16x8xf32> to vector<4x16x8xbf16>
    %c0_10 = arith.constant 0 : index
    %c0_11 = arith.constant 0 : index
    %c0_12 = arith.constant 0 : index
    %16 = vector.load %arg5[%c0_10, %c0_11, %c0_12] : memref<4x32x8xbf16, #tpu.memory_space<vmem>>, vector<4x32x8xbf16>
    "tpu.trace_start"() <{level = 10 : i32, message = "hmc,hcd->hmd"}> : () -> ()
    %cst_13 = arith.constant dense<0.000000e+00> : vector<4x16x8xf32>
    %17 = tpu.matmul %9, %16, %cst_13 {dimension_numbers = #tpu.dot_dimension_numbers<[2], [1], [1], [2], [0, 0, 0, 1, 1, 2], [0], [0]>} : vector<4x16x32xbf16>, vector<4x32x8xbf16>, vector<4x16x8xf32> -> vector<4x16x8xf32>
    "tpu.trace_stop"() : () -> ()
    %18 = arith.truncf %17 : vector<4x16x8xf32> to vector<4x16x8xbf16>
    %c0_14 = arith.constant 0 : index
    %c0_15 = arith.constant 0 : index
    %c0_16 = arith.constant 0 : index
    %19 = vector.load %arg6[%c0_14, %c0_15, %c0_16] : memref<4x8x32xbf16, #tpu.memory_space<vmem>>, vector<4x8x32xbf16>
    %c0_17 = arith.constant 0 : index
    %c0_18 = arith.constant 0 : index
    %20 = vector.load %arg7[%c0_17, %c0_18] : memref<1x32xf32, #tpu.memory_space<vmem>>, vector<1x32xf32>
    %21 = vector.extract_strided_slice %12 {offsets = [0, 0, 0], sizes = [4, 8, 8], strides = [1, 1, 1]} : vector<4x16x8xbf16> to vector<4x8x8xbf16>
    %22 = vector.extract_strided_slice %15 {offsets = [0, 0, 0], sizes = [4, 8, 8], strides = [1, 1, 1]} : vector<4x16x8xbf16> to vector<4x8x8xbf16>
    %23 = vector.extract_strided_slice %18 {offsets = [0, 0, 0], sizes = [4, 8, 8], strides = [1, 1, 1]} : vector<4x16x8xbf16> to vector<4x8x8xbf16>
    "tpu.trace_start"() <{level = 10 : i32, message = "hqd,hkd->hqk"}> : () -> ()
    %cst_19 = arith.constant dense<0.000000e+00> : vector<4x8x8xf32>
    %24 = tpu.matmul %21, %22, %cst_19 {dimension_numbers = #tpu.dot_dimension_numbers<[2], [2], [1], [1], [0, 0, 0, 1, 1, 1], [0], [0]>} : vector<4x8x8xbf16>, vector<4x8x8xbf16>, vector<4x8x8xf32> -> vector<4x8x8xf32>
    "tpu.trace_stop"() : () -> ()
    %cst_20 = arith.constant dense<0xFF800000> : vector<4x8xf32>
    %25 = vector.multi_reduction <maximumf>, %24, %cst_20 [2] : vector<4x8x8xf32> to vector<4x8xf32>
    %26 = vector.shape_cast %25 : vector<4x8xf32> to vector<4x8x1xf32>
    %27 = vector.broadcast %26 : vector<4x8x1xf32> to vector<4x8x8xf32>
    %28 = arith.subf %24, %27 : vector<4x8x8xf32>
    %29 = math.exp %28 : vector<4x8x8xf32>
    %cst_21 = arith.constant dense<0.000000e+00> : vector<4x8xf32>
    %30 = vector.multi_reduction <add>, %29, %cst_21 [2] : vector<4x8x8xf32> to vector<4x8xf32>
    %31 = vector.shape_cast %30 : vector<4x8xf32> to vector<4x8x1xf32>
    %32 = tpu.reciprocal %31 {approx = true} : vector<4x8x1xf32> -> vector<4x8x1xf32>
    %33 = vector.broadcast %32 : vector<4x8x1xf32> to vector<4x8x8xf32>
    %34 = arith.mulf %29, %33 : vector<4x8x8xf32>
    %35 = arith.truncf %34 : vector<4x8x8xf32> to vector<4x8x8xbf16>
    "tpu.trace_start"() <{level = 10 : i32, message = "hqk,hkd->hqd"}> : () -> ()
    %cst_22 = arith.constant dense<0.000000e+00> : vector<4x8x8xf32>
    %36 = tpu.matmul %35, %23, %cst_22 {dimension_numbers = #tpu.dot_dimension_numbers<[2], [1], [1], [2], [0, 0, 0, 1, 1, 2], [0], [0]>} : vector<4x8x8xbf16>, vector<4x8x8xbf16>, vector<4x8x8xf32> -> vector<4x8x8xf32>
    "tpu.trace_stop"() : () -> ()
    %37 = arith.truncf %36 : vector<4x8x8xf32> to vector<4x8x8xbf16>
    %38 = vector.extract_strided_slice %37 {offsets = [0, 0, 0], sizes = [1, 8, 8], strides = [1, 1, 1]} : vector<4x8x8xbf16> to vector<1x8x8xbf16>
    %39 = vector.shape_cast %38 : vector<1x8x8xbf16> to vector<8x8xbf16>
    %40 = vector.extract_strided_slice %19 {offsets = [0, 0, 0], sizes = [1, 8, 32], strides = [1, 1, 1]} : vector<4x8x32xbf16> to vector<1x8x32xbf16>
    %41 = vector.shape_cast %40 : vector<1x8x32xbf16> to vector<8x32xbf16>
    %cst_23 = arith.constant dense<0.000000e+00> : vector<8x32xf32>
    %42 = tpu.matmul %39, %41, %cst_23 {dimension_numbers = #tpu.dot_dimension_numbers<[1], [0], [0], [1], [0, 0, 1, 1], [], []>} : vector<8x8xbf16>, vector<8x32xbf16>, vector<8x32xf32> -> vector<8x32xf32>
    %43 = vector.extract_strided_slice %37 {offsets = [1, 0, 0], sizes = [1, 8, 8], strides = [1, 1, 1]} : vector<4x8x8xbf16> to vector<1x8x8xbf16>
    %44 = vector.shape_cast %43 : vector<1x8x8xbf16> to vector<8x8xbf16>
    %45 = vector.extract_strided_slice %19 {offsets = [1, 0, 0], sizes = [1, 8, 32], strides = [1, 1, 1]} : vector<4x8x32xbf16> to vector<1x8x32xbf16>
    %46 = vector.shape_cast %45 : vector<1x8x32xbf16> to vector<8x32xbf16>
    %cst_24 = arith.constant dense<0.000000e+00> : vector<8x32xf32>
    %47 = tpu.matmul %44, %46, %cst_24 {dimension_numbers = #tpu.dot_dimension_numbers<[1], [0], [0], [1], [0, 0, 1, 1], [], []>} : vector<8x8xbf16>, vector<8x32xbf16>, vector<8x32xf32> -> vector<8x32xf32>
    %48 = arith.addf %42, %47 : vector<8x32xf32>
    %49 = vector.extract_strided_slice %37 {offsets = [2, 0, 0], sizes = [1, 8, 8], strides = [1, 1, 1]} : vector<4x8x8xbf16> to vector<1x8x8xbf16>
    %50 = vector.shape_cast %49 : vector<1x8x8xbf16> to vector<8x8xbf16>
    %51 = vector.extract_strided_slice %19 {offsets = [2, 0, 0], sizes = [1, 8, 32], strides = [1, 1, 1]} : vector<4x8x32xbf16> to vector<1x8x32xbf16>
    %52 = vector.shape_cast %51 : vector<1x8x32xbf16> to vector<8x32xbf16>
    %cst_25 = arith.constant dense<0.000000e+00> : vector<8x32xf32>
    %53 = tpu.matmul %50, %52, %cst_25 {dimension_numbers = #tpu.dot_dimension_numbers<[1], [0], [0], [1], [0, 0, 1, 1], [], []>} : vector<8x8xbf16>, vector<8x32xbf16>, vector<8x32xf32> -> vector<8x32xf32>
    %54 = arith.addf %48, %53 : vector<8x32xf32>
    %55 = vector.extract_strided_slice %37 {offsets = [3, 0, 0], sizes = [1, 8, 8], strides = [1, 1, 1]} : vector<4x8x8xbf16> to vector<1x8x8xbf16>
    %56 = vector.shape_cast %55 : vector<1x8x8xbf16> to vector<8x8xbf16>
    %57 = vector.extract_strided_slice %19 {offsets = [3, 0, 0], sizes = [1, 8, 32], strides = [1, 1, 1]} : vector<4x8x32xbf16> to vector<1x8x32xbf16>
    %58 = vector.shape_cast %57 : vector<1x8x32xbf16> to vector<8x32xbf16>
    %cst_26 = arith.constant dense<0.000000e+00> : vector<8x32xf32>
    %59 = tpu.matmul %56, %58, %cst_26 {dimension_numbers = #tpu.dot_dimension_numbers<[1], [0], [0], [1], [0, 0, 1, 1], [], []>} : vector<8x8xbf16>, vector<8x32xbf16>, vector<8x32xf32> -> vector<8x32xf32>
    %60 = arith.addf %54, %59 : vector<8x32xf32>
    %61 = vector.broadcast %20 : vector<1x32xf32> to vector<8x32xf32>
    %62 = arith.addf %60, %61 : vector<8x32xf32>
    %c0_27 = arith.constant 0 : index
    %c0_28 = arith.constant 0 : index
    %63 = vector.load %arg8[%c0_27, %c0_28] : memref<16x32xf32, #tpu.memory_space<vmem>>, vector<8x32xf32>
    tpu.vector_store %arg8[%c0_27, %c0_28], %62 {strides = array<i32>} : memref<16x32xf32, #tpu.memory_space<vmem>>, vector<8x32xf32>,
    %64 = vector.extract_strided_slice %12 {offsets = [0, 8, 0], sizes = [4, 8, 8], strides = [1, 1, 1]} : vector<4x16x8xbf16> to vector<4x8x8xbf16>
    %65 = vector.extract_strided_slice %15 {offsets = [0, 8, 0], sizes = [4, 8, 8], strides = [1, 1, 1]} : vector<4x16x8xbf16> to vector<4x8x8xbf16>
    %66 = vector.extract_strided_slice %18 {offsets = [0, 8, 0], sizes = [4, 8, 8], strides = [1, 1, 1]} : vector<4x16x8xbf16> to vector<4x8x8xbf16>
    "tpu.trace_start"() <{level = 10 : i32, message = "hqd,hkd->hqk"}> : () -> ()
    %cst_29 = arith.constant dense<0.000000e+00> : vector<4x8x8xf32>
    %67 = tpu.matmul %64, %65, %cst_29 {dimension_numbers = #tpu.dot_dimension_numbers<[2], [2], [1], [1], [0, 0, 0, 1, 1, 1], [0], [0]>} : vector<4x8x8xbf16>, vector<4x8x8xbf16>, vector<4x8x8xf32> -> vector<4x8x8xf32>
    "tpu.trace_stop"() : () -> ()
    %cst_30 = arith.constant dense<0xFF800000> : vector<4x8xf32>
    %68 = vector.multi_reduction <maximumf>, %67, %cst_30 [2] : vector<4x8x8xf32> to vector<4x8xf32>
    %69 = vector.shape_cast %68 : vector<4x8xf32> to vector<4x8x1xf32>
    %70 = vector.broadcast %69 : vector<4x8x1xf32> to vector<4x8x8xf32>
    %71 = arith.subf %67, %70 : vector<4x8x8xf32>
    %72 = math.exp %71 : vector<4x8x8xf32>
    %cst_31 = arith.constant dense<0.000000e+00> : vector<4x8xf32>
    %73 = vector.multi_reduction <add>, %72, %cst_31 [2] : vector<4x8x8xf32> to vector<4x8xf32>
    %74 = vector.shape_cast %73 : vector<4x8xf32> to vector<4x8x1xf32>
    %75 = tpu.reciprocal %74 {approx = true} : vector<4x8x1xf32> -> vector<4x8x1xf32>
    %76 = vector.broadcast %75 : vector<4x8x1xf32> to vector<4x8x8xf32>
    %77 = arith.mulf %72, %76 : vector<4x8x8xf32>
    %78 = arith.truncf %77 : vector<4x8x8xf32> to vector<4x8x8xbf16>
    "tpu.trace_start"() <{level = 10 : i32, message = "hqk,hkd->hqd"}> : () -> ()
    %cst_32 = arith.constant dense<0.000000e+00> : vector<4x8x8xf32>
    %79 = tpu.matmul %78, %66, %cst_32 {dimension_numbers = #tpu.dot_dimension_numbers<[2], [1], [1], [2], [0, 0, 0, 1, 1, 2], [0], [0]>} : vector<4x8x8xbf16>, vector<4x8x8xbf16>, vector<4x8x8xf32> -> vector<4x8x8xf32>
    "tpu.trace_stop"() : () -> ()
    %80 = arith.truncf %79 : vector<4x8x8xf32> to vector<4x8x8xbf16>
    %81 = vector.extract_strided_slice %80 {offsets = [0, 0, 0], sizes = [1, 8, 8], strides = [1, 1, 1]} : vector<4x8x8xbf16> to vector<1x8x8xbf16>
    %82 = vector.shape_cast %81 : vector<1x8x8xbf16> to vector<8x8xbf16>
    %83 = vector.extract_strided_slice %19 {offsets = [0, 0, 0], sizes = [1, 8, 32], strides = [1, 1, 1]} : vector<4x8x32xbf16> to vector<1x8x32xbf16>
    %84 = vector.shape_cast %83 : vector<1x8x32xbf16> to vector<8x32xbf16>
    %cst_33 = arith.constant dense<0.000000e+00> : vector<8x32xf32>
    %85 = tpu.matmul %82, %84, %cst_33 {dimension_numbers = #tpu.dot_dimension_numbers<[1], [0], [0], [1], [0, 0, 1, 1], [], []>} : vector<8x8xbf16>, vector<8x32xbf16>, vector<8x32xf32> -> vector<8x32xf32>
    %86 = vector.extract_strided_slice %80 {offsets = [1, 0, 0], sizes = [1, 8, 8], strides = [1, 1, 1]} : vector<4x8x8xbf16> to vector<1x8x8xbf16>
    %87 = vector.shape_cast %86 : vector<1x8x8xbf16> to vector<8x8xbf16>
    %88 = vector.extract_strided_slice %19 {offsets = [1, 0, 0], sizes = [1, 8, 32], strides = [1, 1, 1]} : vector<4x8x32xbf16> to vector<1x8x32xbf16>
    %89 = vector.shape_cast %88 : vector<1x8x32xbf16> to vector<8x32xbf16>
    %cst_34 = arith.constant dense<0.000000e+00> : vector<8x32xf32>
    %90 = tpu.matmul %87, %89, %cst_34 {dimension_numbers = #tpu.dot_dimension_numbers<[1], [0], [0], [1], [0, 0, 1, 1], [], []>} : vector<8x8xbf16>, vector<8x32xbf16>, vector<8x32xf32> -> vector<8x32xf32>
    %91 = arith.addf %85, %90 : vector<8x32xf32>
    %92 = vector.extract_strided_slice %80 {offsets = [2, 0, 0], sizes = [1, 8, 8], strides = [1, 1, 1]} : vector<4x8x8xbf16> to vector<1x8x8xbf16>
    %93 = vector.shape_cast %92 : vector<1x8x8xbf16> to vector<8x8xbf16>
    %94 = vector.extract_strided_slice %19 {offsets = [2, 0, 0], sizes = [1, 8, 32], strides = [1, 1, 1]} : vector<4x8x32xbf16> to vector<1x8x32xbf16>
    %95 = vector.shape_cast %94 : vector<1x8x32xbf16> to vector<8x32xbf16>
    %cst_35 = arith.constant dense<0.000000e+00> : vector<8x32xf32>
    %96 = tpu.matmul %93, %95, %cst_35 {dimension_numbers = #tpu.dot_dimension_numbers<[1], [0], [0], [1], [0, 0, 1, 1], [], []>} : vector<8x8xbf16>, vector<8x32xbf16>, vector<8x32xf32> -> vector<8x32xf32>
    %97 = arith.addf %91, %96 : vector<8x32xf32>
    %98 = vector.extract_strided_slice %80 {offsets = [3, 0, 0], sizes = [1, 8, 8], strides = [1, 1, 1]} : vector<4x8x8xbf16> to vector<1x8x8xbf16>
    %99 = vector.shape_cast %98 : vector<1x8x8xbf16> to vector<8x8xbf16>
    %100 = vector.extract_strided_slice %19 {offsets = [3, 0, 0], sizes = [1, 8, 32], strides = [1, 1, 1]} : vector<4x8x32xbf16> to vector<1x8x32xbf16>
    %101 = vector.shape_cast %100 : vector<1x8x32xbf16> to vector<8x32xbf16>
    %cst_36 = arith.constant dense<0.000000e+00> : vector<8x32xf32>
    %102 = tpu.matmul %99, %101, %cst_36 {dimension_numbers = #tpu.dot_dimension_numbers<[1], [0], [0], [1], [0, 0, 1, 1], [], []>} : vector<8x8xbf16>, vector<8x32xbf16>, vector<8x32xf32> -> vector<8x32xf32>
    %103 = arith.addf %97, %102 : vector<8x32xf32>
    %104 = vector.broadcast %20 : vector<1x32xf32> to vector<8x32xf32>
    %105 = arith.addf %103, %104 : vector<8x32xf32>
    %c8 = arith.constant 8 : index
    %c0_37 = arith.constant 0 : index
    %106 = vector.load %arg8[%c8, %c0_37] : memref<16x32xf32, #tpu.memory_space<vmem>>, vector<8x32xf32>
    tpu.vector_store %arg8[%c8, %c0_37], %105 {strides = array<i32>} : memref<16x32xf32, #tpu.memory_space<vmem>>, vector<8x32xf32>,
    return
  }
  func.func @transform_0(%arg0: i32) -> (i32, i32) {
    %c0_i32 = arith.constant 0 : i32
    %c0_i32_0 = arith.constant 0 : i32
    return %arg0, %c0_i32 : i32, i32
  }
  func.func @transform_1(%arg0: i32) -> (i32, i32) {
    %c0_i32 = arith.constant 0 : i32
    %c0_i32_0 = arith.constant 0 : i32
    return %arg0, %c0_i32 : i32, i32
  }
  func.func @transform_2(%arg0: i32) -> (i32, i32, i32) {
    %c0_i32 = arith.constant 0 : i32
    %c0_i32_0 = arith.constant 0 : i32
    %c0_i32_1 = arith.constant 0 : i32
    %c0_i32_2 = arith.constant 0 : i32
    return %c0_i32, %c0_i32_0, %c0_i32_1 : i32, i32, i32
  }
  func.func @transform_3(%arg0: i32) -> (i32, i32, i32) {
    %c0_i32 = arith.constant 0 : i32
    %c0_i32_0 = arith.constant 0 : i32
    %c0_i32_1 = arith.constant 0 : i32
    %c0_i32_2 = arith.constant 0 : i32
    return %c0_i32, %c0_i32_0, %c0_i32_1 : i32, i32, i32
  }
  func.func @transform_4(%arg0: i32) -> (i32, i32, i32) {
    %c0_i32 = arith.constant 0 : i32
    %c0_i32_0 = arith.constant 0 : i32
    %c0_i32_1 = arith.constant 0 : i32
    %c0_i32_2 = arith.constant 0 : i32
    return %c0_i32, %c0_i32_0, %c0_i32_1 : i32, i32, i32
  }
  func.func @transform_5(%arg0: i32) -> (i32, i32, i32) {
    %c0_i32 = arith.constant 0 : i32
    %c0_i32_0 = arith.constant 0 : i32
    %c0_i32_1 = arith.constant 0 : i32
    %c0_i32_2 = arith.constant 0 : i32
    return %c0_i32, %c0_i32_0, %c0_i32_1 : i32, i32, i32
  }
  func.func @transform_6(%arg0: i32) -> (i32, i32) {
    %c0_i32 = arith.constant 0 : i32
    %c0_i32_0 = arith.constant 0 : i32
    %c0_i32_1 = arith.constant 0 : i32
    return %c0_i32, %c0_i32_0 : i32, i32
  }
  func.func @transform_7(%arg0: i32) -> (i32, i32) {
    %c0_i32 = arith.constant 0 : i32
    %c0_i32_0 = arith.constant 0 : i32
    return %arg0, %c0_i32 : i32, i32
  }
}

</mosaic_0001>

<bundles_post_ra>
// kernel: tpu_custom_call.1
= control target key start
LH: loop header
LB: loop body
LE: loop exit
PB: predicated region body
PF: predicated region fallthrough
CT: control target
= control target key end

     0   :  { %v2464_v1 = vmov 0.0   ;;  %vm2465_vm0 = vmmov 0   ;;  %vm62_vm1 = vcmask 261120   ;;  %s2882_s0 = inlined_call_operand.vmem [shape: f32[16,32], index: 0, kind: input, shape index: {}]   ;;  %s2883_s1 = inlined_call_operand.vmem [shape: f32[16,32], index: 1, kind: input, shape index: {}]   ;;  %s2884_s2 = inlined_call_operand.vmem [shape: bf16[4,32,8], index: 2, kind: input, shape index: {}]   ;;  %s2885_s3 = inlined_call_operand.vmem [shape: bf16[4,32,8], index: 3, kind: input, shape index: {}]   ;;  %s2886_s4 = inlined_call_operand.vmem [shape: bf16[4,32,8], index: 4, kind: input, shape index: {}]   ;;  %s2887_s5 = inlined_call_operand.vmem [shape: bf16[4,8,32], index: 5, kind: input, shape index: {}]   ;;  %s2888_s6 = inlined_call_operand.vmem [shape: f32[1,32], index: 6, kind: input, shape index: {}]   ;;  %s2889_s7 = inlined_call_operand.hbm [shape: f32[16,32], index: 7, kind: output, shape index: {}]  }
   0x1   :  { %v2384_v0 = vld [vmem:[%s2884_s2] sm:$0xff]   ;;  %2139 = vmatprep.subr.bf16.mxu0 %v2464_v1  ;;  %2147 = vmatprep.subr.bf16.mxu1 %v2464_v1  ;;  %v2385_v2 = vld [vmem:[%s2884_s2 + $0x10] sm:$0xff]   ;;  %v2386_v3 = vld [vmem:[%s2884_s2 + $0x8] sm:$0xff]  }
   0x2   :  { %2140 = vmatpush3.bf16.msra.mxu0 %v2384_v0  ;;  %2143 = vmatprep.mubr.msk.bf16.mxu0 %vm2465_vm0, %v2464_v1  ;;  %v2387_v4 = vld [vmem:[%s2884_s2 + $0x18] sm:$0xff]   ;;  %v28_v5 = vld [vmem:[%s2882_s0] sm:$0xff]  ;;  %v29_v6 = vld [vmem:[%s2882_s0 + $0x8] sm:$0xff] }
   0x3   :  { %2148 = vmatpush3.bf16.msra.mxu1 %v2385_v2  ;;  %2141 = vmatprep.subr.bf16.mxu0 %v2464_v1  ;;  %v30_v7 = vpack.c.bf16 %v29_v6, %v28_v5  ;;  %v2388_v8 = vld [vmem:[%s2884_s2 + $0x20] sm:$0xff]   ;;  %v2389_v9 = vld [vmem:[%s2884_s2 + $0x30] sm:$0xff]   ;;  %v2390_v10 = vld [vmem:[%s2884_s2 + $0x28] sm:$0xff]  }
   0x4   :  { %2149 = vmatprep.subr.bf16.mxu1 %v2464_v1  ;;  %2151 = vmatprep.mubr.msk.bf16.mxu1 %vm2465_vm0, %v2464_v1  ;;  %v2391_v11 = vld [vmem:[%s2884_s2 + $0x38] sm:$0xff]   ;;  %v2392_v12 = vld [vmem:[%s2885_s3] sm:$0xff]   ;;  %v2393_v13 = vld [vmem:[%s2885_s3 + $0x10] sm:$0xff]  }
   0x5   :  { %v2394_v14 = vld [vmem:[%s2885_s3 + $0x8] sm:$0xff]   ;;  %v2395_v15 = vld [vmem:[%s2885_s3 + $0x18] sm:$0xff]   ;;  %v31_v16 = vld [vmem:[%s2883_s1] sm:$0xff] }
   0x6   :  { %2142 = vmatpush3.bf16.msra.mxu0 %v2386_v3  ;;  %v32_v17 = vld [vmem:[%s2883_s1 + $0x8] sm:$0xff]  ;;  %v2396_v18 = vld [vmem:[%s2885_s3 + $0x20] sm:$0xff]   ;;  %v2397_v20 = vld [vmem:[%s2885_s3 + $0x30] sm:$0xff]  }
   0x7   :  { %2150 = vmatpush3.bf16.msra.mxu1 %v2387_v4  ;;  %2155 = vmatprep.subr.bf16.mxu0 %v2464_v1  ;;  %v33_v19 = vpack.c.bf16 %v32_v17, %v31_v16 }
   0x8   :  { %2163 = vmatprep.subr.bf16.mxu1 %v2464_v1 }
   0x9   :  { %2144 = vmatmul.mubr.msk.bf16.vlgmr.msra.gmra.mrb[0].mxu0 %vm62_vm1, %v30_v7 }
   0xa   :  { %2152 = vmatmul.mubr.msk.bf16.vlgmr.msra.gmra.mrb[0].mxu1 %vm62_vm1, %v30_v7  ;;  %2156 = vmatpush3.bf16.msra.mxu0 %v2388_v8 }
   0xb   :  { %2164 = vmatpush3.bf16.msra.mxu1 %v2389_v9  ;;  %2157 = vmatprep.subr.bf16.mxu0 %v2464_v1 }
   0xc   :  { %2165 = vmatprep.subr.bf16.mxu1 %v2464_v1  ;;  %2159 = vmatprep.mubr.msk.bf16.mxu0 %vm2465_vm0, %v2464_v1 }
   0xd   :  { %2167 = vmatprep.mubr.msk.bf16.mxu1 %vm2465_vm0, %v2464_v1 }
   0xe   :  { %2158 = vmatpush3.bf16.msra.mxu0 %v2390_v10 }
   0xf   :  { %2166 = vmatpush3.bf16.msra.mxu1 %v2391_v11  ;;  %2171 = vmatprep.subr.bf16.mxu0 %v2464_v1 }
  0x10   :  { %2179 = vmatprep.subr.bf16.mxu1 %v2464_v1 }
  0x11   :  { %2160 = vmatmul.mubr.msk.bf16.vlgmr.msra.gmra.mrb[4].mxu0 %vm62_vm1, %v30_v7 }
  0x12   :  { %2168 = vmatmul.mubr.msk.bf16.vlgmr.msra.gmra.mrb[4].mxu1 %vm62_vm1, %v30_v7  ;;  %2172 = vmatpush3.bf16.msra.mxu0 %v2392_v12 }
  0x13   :  { %2180 = vmatpush3.bf16.msra.mxu1 %v2393_v13  ;;  %2173 = vmatprep.subr.bf16.mxu0 %v2464_v1 }
  0x14   :  { %2181 = vmatprep.subr.bf16.mxu1 %v2464_v1  ;;  %2175 = vmatprep.mubr.msk.bf16.mxu0 %vm2465_vm0, %v2464_v1 }
  0x15   :  { %2183 = vmatprep.mubr.msk.bf16.mxu1 %vm2465_vm0, %v2464_v1 }
  0x16   :  { %2174 = vmatpush3.bf16.msra.mxu0 %v2394_v14 }
  0x17   :  { %2182 = vmatpush3.bf16.msra.mxu1 %v2395_v15  ;;  %2187 = vmatprep.subr.bf16.mxu0 %v2464_v1 }
  0x18   :  { %12 = vsyncpa [#allocation3], 0  ;;  %2195 = vmatprep.subr.bf16.mxu1 %v2464_v1  ;;  %v2398_v21 = vld [vmem:[%s2885_s3 + $0x28] sm:$0xff]   ;;  %v2399_v22 = vld [vmem:[%s2885_s3 + $0x38] sm:$0xff]   ;;  %vm742_vm2 = vcmask 64512   ;;  %vm978_vm3 = vcmask 1043456  }
  0x19   :  { %2176 = vmatmul.mubr.msk.bf16.vlgmr.msra.gmra.mrb[8].mxu0 %vm62_vm1, %v33_v19  ;;  %v2400_v23 = vld [vmem:[%s2886_s4] sm:$0xff]   ;;  %v2401_v24 = vld [vmem:[%s2886_s4 + $0x10] sm:$0xff]   ;;  %v2402_v25 = vld [vmem:[%s2886_s4 + $0x8] sm:$0xff]  }
  0x1a   :  { %2184 = vmatmul.mubr.msk.bf16.vlgmr.msra.gmra.mrb[8].mxu1 %vm62_vm1, %v33_v19  ;;  %2188 = vmatpush3.bf16.msra.mxu0 %v2396_v18  ;;  %v2403_v26 = vld [vmem:[%s2886_s4 + $0x18] sm:$0xff]   ;;  %v2404_v27 = vld [vmem:[%s2886_s4 + $0x20] sm:$0xff]   ;;  %v2405_v28 = vld [vmem:[%s2886_s4 + $0x30] sm:$0xff]  }
  0x1b   :  { %2196 = vmatpush3.bf16.msra.mxu1 %v2397_v20  ;;  %2189 = vmatprep.subr.bf16.mxu0 %v2464_v1  ;;  %v2406_v29 = vld [vmem:[%s2886_s4 + $0x28] sm:$0xff]   ;;  %v2407_v30 = vld [vmem:[%s2886_s4 + $0x38] sm:$0xff]  }
  0x1c   :  { %2197 = vmatprep.subr.bf16.mxu1 %v2464_v1  ;;  %2191 = vmatprep.mubr.msk.bf16.mxu0 %vm2465_vm0, %v2464_v1 }
  0x1d   :  { %2199 = vmatprep.mubr.msk.bf16.mxu1 %vm2465_vm0, %v2464_v1 }
  0x1e   :  { %2190 = vmatpush3.bf16.msra.mxu0 %v2398_v21 }
  0x1f   :  { %2198 = vmatpush3.bf16.msra.mxu1 %v2399_v22  ;;  %2203 = vmatprep.subr.bf16.mxu0 %v2464_v1 }
  0x20   :  { %2211 = vmatprep.subr.bf16.mxu1 %v2464_v1 }
  0x21   :  { %2192 = vmatmul.mubr.msk.bf16.vlgmr.msra.gmra.mrb[12].mxu0 %vm62_vm1, %v33_v19 }
  0x22   :  { %2200 = vmatmul.mubr.msk.bf16.vlgmr.msra.gmra.mrb[12].mxu1 %vm62_vm1, %v33_v19  ;;  %2204 = vmatpush3.bf16.msra.mxu0 %v2400_v23 }
  0x23   :  { %2205 = vmatprep.subr.bf16.mxu0 %v2464_v1  ;;  %2207 = vmatprep.mubr.msk.bf16.mxu0 %vm2465_vm0, %v2464_v1 }
  0x24   :  { %2215 = vmatprep.mubr.msk.bf16.mxu1 %vm2465_vm0, %v2464_v1  ;;  %2212 = vmatpush3.bf16.msra.mxu1 %v2401_v24 }
  0x25   :  { %2213 = vmatprep.subr.bf16.mxu1 %v2464_v1 }
  0x26   :  { %2206 = vmatpush3.bf16.msra.mxu0 %v2402_v25 }
  0x27   :  { %2219 = vmatprep.subr.bf16.mxu0 %v2464_v1 }
  0x28   :  { %2214 = vmatpush3.bf16.msra.mxu1 %v2403_v26 }
  0x29   :  { %2208 = vmatmul.mubr.msk.bf16.vlgmr.msra.gmra.mrb[16].mxu0 %vm62_vm1, %v33_v19  ;;  %2227 = vmatprep.subr.bf16.mxu1 %v2464_v1 }
  0x2a   :  { %2223 = vmatprep.mubr.msk.bf16.mxu0 %vm2465_vm0, %v2464_v1  ;;  %2220 = vmatpush3.bf16.msra.mxu0 %v2404_v27 }
  0x2b   :  { %2216 = vmatmul.mubr.msk.bf16.vlgmr.msra.gmra.mrb[16].mxu1 %vm62_vm1, %v33_v19  ;;  %2221 = vmatprep.subr.bf16.mxu0 %v2464_v1 }
  0x2c   :  { %2228 = vmatpush3.bf16.msra.mxu1 %v2405_v28  ;;  %2231 = vmatprep.mubr.msk.bf16.mxu1 %vm2465_vm0, %v2464_v1 }
  0x2d   :  { %2229 = vmatprep.subr.bf16.mxu1 %v2464_v1 }
  0x2e   :  { %2222 = vmatpush3.bf16.msra.mxu0 %v2406_v29 }
  0x2f   :  { %2235 = vmatprep.subr.bf16.mxu0 %v2464_v1 }
  0x30   :  { %2230 = vmatpush3.bf16.msra.mxu1 %v2407_v30 }
  0x31   :  { %2241 = vmatprep.subr.bf16.mxu1 %v2464_v1  ;;  %2224 = vmatmul.mubr.msk.bf16.vlgmr.msra.gmra.mrb[20].mxu0 %vm62_vm1, %v33_v19 }
  0x32   :  { %2237 = vmatprep.mubr.msk.bf16.mxu0 %vm2465_vm0, %v2464_v1 }
  0x33   :  { %2232 = vmatmul.mubr.msk.bf16.vlgmr.msra.gmra.mrb[20].mxu1 %vm62_vm1, %v33_v19 }
  0x34   :  { %2243 = vmatprep.mubr.msk.bf16.mxu1 %vm2465_vm0, %v2464_v1 }
  0xdc   :  { %v100_v31 = vpop.f32.mrb[0].mxu0 }
  0xdd   :  { %v2145_v32 = vpop.f32.mrb[1].mxu0  ;;  %v153_v33 = vpop.f32.mrb[0].mxu1 }
  0xde   :  { %v103_v34 = vpop.f32.mrb[2].mxu0  ;;  %v2153_v35 = vpop.f32.mrb[1].mxu1 }
  0xdf   :  { %v2659_v36 = vpack.c.bf16 %v103_v34, %v100_v31  ;;  %v2146_v37 = vpop.f32.mrb[3].mxu0  ;;  %v156_v38 = vpop.f32.mrb[2].mxu1 }
  0xe0   :  { %v2661_v39 = vpack.c.bf16 %v156_v38, %v153_v33  ;;  %v2154_v40 = vpop.f32.mrb[3].mxu1 }
  0xe4   :  { %v206_v41 = vpop.f32.mrb[4].mxu0 }
  0xe5   :  { %v2161_v42 = vpop.f32.mrb[5].mxu0  ;;  %v259_v43 = vpop.f32.mrb[4].mxu1 }
  0xe6   :  { %v209_v44 = vpop.f32.mrb[6].mxu0  ;;  %v2169_v45 = vpop.f32.mrb[5].mxu1 }
  0xe7   :  { %v2663_v46 = vpack.c.bf16 %v209_v44, %v206_v41  ;;  %v2162_v47 = vpop.f32.mrb[7].mxu0  ;;  %v262_v48 = vpop.f32.mrb[6].mxu1 }
  0xe8   :  { %v2665_v49 = vpack.c.bf16 %v262_v48, %v259_v43  ;;  %v2170_v50 = vpop.f32.mrb[7].mxu1 }
  0xec   :  { %v335_v51 = vpop.f32.mrb[8].mxu0 }
  0xed   :  { %v388_v52 = vpop.f32.mrb[8].mxu1  ;;  %v2177_v53 = vpop.f32.mrb[9].mxu0 }
  0xee   :  { %v2185_v54 = vpop.f32.mrb[9].mxu1  ;;  %v338_v55 = vpop.f32.mrb[10].mxu0 }
  0xef   :  { %v2667_v56 = vpack.c.bf16 %v338_v55, %v335_v51  ;;  %v391_v57 = vpop.f32.mrb[10].mxu1  ;;  %v2178_v58 = vpop.f32.mrb[11].mxu0 }
  0xf0   :  { %v2669_v59 = vpack.c.bf16 %v391_v57, %v388_v52  ;;  %v2186_v60 = vpop.f32.mrb[11].mxu1 }
  0xf1   :  { %v747_v61 = vsel %vm742_vm2, %v2667_v56, 0 }
  0xf2   :  { %v793_v62 = vsel %vm742_vm2, %v2669_v59, 0  ;;  %2236 = vmatpush3.bf16.xpose.msra.mxu0 %v747_v61 }
  0xf3   :  { %2242 = vmatpush3.bf16.xpose.msra.mxu1 %v793_v62  ;;  %2247 = vmatprep.subr.bf16.mxu0 %v2464_v1 }
  0xf4   :  { %v441_v63 = vpop.f32.mrb[12].mxu0  ;;  %2253 = vmatprep.subr.bf16.mxu1 %v2464_v1 }
  0xf5   :  { %v494_v0 = vpop.f32.mrb[12].mxu1  ;;  %v2193_v2 = vpop.f32.mrb[13].mxu0 }
  0xf6   :  { %v2201_v3 = vpop.f32.mrb[13].mxu1  ;;  %v444_v4 = vpop.f32.mrb[14].mxu0 }
  0xf7   :  { %v2677_v5 = vpack.c.bf16 %v444_v4, %v441_v63  ;;  %v497_v6 = vpop.f32.mrb[14].mxu1  ;;  %v2194_v7 = vpop.f32.mrb[15].mxu0 }
  0xf8   :  { %v2679_v8 = vpack.c.bf16 %v497_v6, %v494_v0  ;;  %v2202_v9 = vpop.f32.mrb[15].mxu1 }
  0xf9   :  { %v839_v10 = vsel %vm742_vm2, %v2677_v5, 0  ;;  %2238 = vmatmul.mubr.msk.bf16.vlgmr.msra.gmra.mrb[24].mxu0 %vm742_vm2, %v2659_v36 }
  0xfa   :  { %v885_v11 = vsel %vm742_vm2, %v2679_v8, 0  ;;  %2244 = vmatmul.mubr.msk.bf16.vlgmr.msra.gmra.mrb[24].mxu1 %vm742_vm2, %v2661_v39  ;;  %2248 = vmatpush3.bf16.xpose.msra.mxu0 %v839_v10 }
  0xfb   :  { %2254 = vmatpush3.bf16.xpose.msra.mxu1 %v885_v11  ;;  %2249 = vmatprep.mubr.msk.bf16.mxu0 %vm2465_vm0, %v2464_v1 }
  0xfc   :  { %2255 = vmatprep.mubr.msk.bf16.mxu1 %vm2465_vm0, %v2464_v1  ;;  %2259 = vmatprep.subr.bf16.mxu0 %v2464_v1  ;;  %v567_v12 = vpop.f32.mrb[16].mxu0 }
  0xfd   :  { %2265 = vmatprep.subr.bf16.mxu1 %v2464_v1  ;;  %v2209_v13 = vpop.f32.mrb[17].mxu0 }
  0xfe   :  { %v570_v14 = vpop.f32.mrb[18].mxu0  ;;  %v620_v15 = vpop.f32.mrb[16].mxu1 }
  0xff   :  { %v2703_v16 = vpack.c.bf16 %v570_v14, %v567_v12  ;;  %v2210_v17 = vpop.f32.mrb[19].mxu0  ;;  %v2217_v18 = vpop.f32.mrb[17].mxu1 }
 0x100   :  { %v623_v19 = vpop.f32.mrb[18].mxu1 }
 0x101   :  { %2250 = vmatmul.mubr.msk.bf16.vlgmr.msra.gmra.mrb[28].mxu0 %vm742_vm2, %v2663_v46  ;;  %v980_v20 = vsel %vm978_vm3, %v2703_v16, 0  ;;  %v2707_v21 = vpack.c.bf16 %v623_v19, %v620_v15  ;;  %v2218_v22 = vpop.f32.mrb[19].mxu1 }
 0x102   :  { %2256 = vmatmul.mubr.msk.bf16.vlgmr.msra.gmra.mrb[28].mxu1 %vm742_vm2, %v2665_v49  ;;  %2261 = vmatprep.mubr.msk.bf16.mxu0 %vm2465_vm0, %v2464_v1 }
 0x103   :  { %2267 = vmatprep.mubr.msk.bf16.mxu1 %vm2465_vm0, %v2464_v1  ;;  %2260 = vmatpush3.bf16.msra.mxu0 %v980_v20  ;;  %v1026_v23 = vsel %vm978_vm3, %v2707_v21, 0 }
 0x104   :  { %2271 = vmatprep.subr.bf16.mxu0 %v2464_v1  ;;  %2266 = vmatpush3.bf16.msra.mxu1 %v1026_v23  ;;  %v673_v24 = vpop.f32.mrb[20].mxu0 }
 0x105   :  { %2277 = vmatprep.subr.bf16.mxu1 %v2464_v1  ;;  %v2225_v26 = vpop.f32.mrb[21].mxu0 }
 0x106   :  { %v726_v25 = vpop.f32.mrb[20].mxu1  ;;  %v676_v28 = vpop.f32.mrb[22].mxu0 }
 0x107   :  { %v2233_v27 = vpop.f32.mrb[21].mxu1  ;;  %v2713_v30 = vpack.c.bf16 %v676_v28, %v673_v24  ;;  %v2226_v31 = vpop.f32.mrb[23].mxu0 }
 0x108   :  { %v729_v29 = vpop.f32.mrb[22].mxu1 }
 0x109   :  { %v2715_v32 = vpack.c.bf16 %v729_v29, %v726_v25  ;;  %v2234_v33 = vpop.f32.mrb[23].mxu1  ;;  %v1072_v29 = vsel %vm978_vm3, %v2713_v30, 0 }
 0x1cc   :  { %v783_v34 = vpop.f32.mrb[24].mxu0 }
 0x1cd   :  { %v829_v35 = vpop.f32.mrb[24].mxu1  ;;  %v2239_v37 = vpop.f32.mrb[25].mxu0  ;;  %v927_v38 = vsel %vm742_vm2, %v783_v34, -inf }
 0x1ce   :  { %v2245_v40 = vpop.f32.mrb[25].mxu1  ;;  %928 = vmax.xlane.f32.xlu0 %v927_v38  ;;  %v786_v41 = vpop.f32.mrb[26].mxu0  ;;  %v930_v45 = vsel %vm742_vm2, %v829_v35, -inf }
 0x1cf   :  { %v832_v42 = vpop.f32.mrb[26].mxu1  ;;  %v2240_v43 = vpop.f32.mrb[27].mxu0 }
 0x1d0   :  { %v2246_v44 = vpop.f32.mrb[27].mxu1  ;;  %v737_v43 = vld [vmem:[%s2887_s5] sm:$0xf] }
 0x1d1   :  { %v2747_v44 = vsel %vm978_vm3, %v737_v43, 0 }
 0x1d2   :  { %931 = vmax.xlane.f32.xlu0 %v930_v45  ;;  %v738_v45 = vld [vmem:[%s2887_s5 + $0x4] sm:$0xf] }
 0x1d4   :  { %v875_v47 = vpop.f32.mrb[28].mxu0 }
 0x1d5   :  { %v921_v48 = vpop.f32.mrb[28].mxu1  ;;  %v2251_v50 = vpop.f32.mrb[29].mxu0  ;;  %v933_v51 = vsel %vm742_vm2, %v875_v47, -inf }
 0x1d6   :  { %v2257_v52 = vpop.f32.mrb[29].mxu1  ;;  %934 = vmax.xlane.f32.xlu1 %v933_v51  ;;  %v878_v53 = vpop.f32.mrb[30].mxu0  ;;  %v936_v58 = vsel %vm742_vm2, %v921_v48, -inf }
 0x1d7   :  { %v924_v54 = vpop.f32.mrb[30].mxu1  ;;  %v2252_v55 = vpop.f32.mrb[31].mxu0 }
 0x1d8   :  { %v2258_v57 = vpop.f32.mrb[31].mxu1  ;;  %v739_v55 = vld [vmem:[%s2887_s5 + $0x8] sm:$0xf] }
 0x1da   :  { %937 = vmax.xlane.f32.xlu1 %v936_v58 }
 0x25b   :  { %v929_v60 = vpop.xlane.xlu0 %928 }
 0x25c   :  { %v939_v61 = vsub.f32 %v783_v34, %v929_v60 }
 0x25e   :  { %v943_v62 = vmul.f32 1.442695, %v939_v61 }
 0x25f   :  { %v932_v63 = vpop.xlane.xlu0 %931 }
 0x260   :  { %2408 = vpow2.f32 %v943_v62  ;;  %v940_v0 = vsub.f32 %v829_v35, %v932_v63  ;;  %v1118_v35 = vsel %vm978_vm3, %v2715_v32, 0  ;;  %v2773_v62 = vsel %vm978_vm3, %v739_v55, 0 }
 0x262   :  { %v945_v2 = vmul.f32 1.442695, %v940_v0 }
 0x263   :  { %v935_v3 = vpop.xlane.xlu1 %934 }
 0x264   :  { %2410 = vpow2.f32 %v945_v2  ;;  %v941_v4 = vsub.f32 %v875_v47, %v935_v3  ;;  %v2754_v47 = vsel %vm978_vm3, %v738_v45, 0 }
 0x266   :  { %v947_v6 = vmul.f32 1.442695, %v941_v4 }
 0x267   :  { %v938_v7 = vpop.xlane.xlu1 %937 }
 0x268   :  { %2412 = vpow2.f32 %v947_v6  ;;  %v942_v9 = vsub.f32 %v921_v48, %v938_v7  ;;  %v740_v48 = vld [vmem:[%s2887_s5 + $0xc] sm:$0xf]  ;;  %v1411_v6 = vrot.slane %v2669_v59, 4  ;;  %v1461_v59 = vrot.slane %v2677_v5, 4 }
 0x269   :  { %v2763_v53 = vsel %vm978_vm3, %v740_v48, 0  ;;  %v1509_v5 = vrot.slane %v2665_v49, 4 }
 0x26a   :  { %v2409_v10 = vpop.eup %2408  ;;  %v949_v11 = vmul.f32 1.442695, %v942_v9  ;;  %v1361_v9 = vrot.slane %v2667_v56, 4  ;;  %v1511_v56 = vrot.slane %v2679_v8, 4  ;;  %v1459_v8 = vrot.slane %v2663_v46, 4 }
 0x26b   :  { %v951_v12 = vsel %vm742_vm2, %v2409_v10, 0.0 }
 0x26c   :  { %2414 = vpow2.f32 %v949_v11  ;;  %952 = vadd.xlane.f32.xlu0 %v951_v12 }
 0x26e   :  { %v2411_v13 = vpop.eup %2410 }
 0x26f   :  { %v954_v14 = vsel %vm742_vm2, %v2411_v13, 0.0 }
 0x270   :  { %955 = vadd.xlane.f32.xlu1 %v954_v14 }
 0x272   :  { %v2413_v15 = vpop.eup %2412 }
 0x273   :  { %v957_v17 = vsel %vm742_vm2, %v2413_v15, 0.0 }
 0x274   :  { %958 = vadd.xlane.f32.xlu0 %v957_v17  ;;  %v1416_v17 = vsel %vm742_vm2, %v1411_v6, 0 }
 0x276   :  { %v2415_v18 = vpop.eup %2414 }
 0x277   :  { %v960_v19 = vsel %vm742_vm2, %v2415_v18, 0.0 }
 0x278   :  { %961 = vadd.xlane.f32.xlu1 %v960_v19  ;;  %v1409_v19 = vrot.slane %v2661_v39, 4  ;;  %v1607_v39 = vrot.slane %v2703_v16, 4 }
 0x2f9   :  { %v953_v20 = vpop.xlane.xlu0 %952 }
 0x2fa   :  { %2416 = vrcp.f32 %v953_v20  ;;  %v1359_v20 = vrot.slane %v2659_v36, 4  ;;  %v1655_v36 = vrot.slane %v2707_v21, 4 }
 0x2fd   :  { %v956_v22 = vpop.xlane.xlu1 %955 }
 0x2fe   :  { %2418 = vrcp.f32 %v956_v22  ;;  %v1516_v22 = vsel %vm742_vm2, %v1511_v56, 0 }
 0x301   :  { %v959_v23 = vpop.xlane.xlu0 %958 }
 0x302   :  { %2420 = vrcp.f32 %v959_v23  ;;  %v1466_v23 = vsel %vm742_vm2, %v1461_v59, 0 }
 0x304   :  { %v2417_v24 = vpop.eup %2416 }
 0x305   :  { %v967_v25 = vmul.f32 %v2417_v24, %v2409_v10  ;;  %v962_v26 = vpop.xlane.xlu1 %961  ;;  %v1660_v24 = vsel %vm978_vm3, %v1655_v36, 0 }
 0x306   :  { %2422 = vrcp.f32 %v962_v26 }
 0x307   :  { %v971_v27 = vpack.c.bf16 %v967_v25, %v967_v25  ;;  %v1612_v25 = vsel %vm978_vm3, %v1607_v39, 0 }
 0x308   :  { %v2419_v28 = vpop.eup %2418 }
 0x309   :  { %v968_v31 = vmul.f32 %v2419_v28, %v2411_v13  ;;  %2262 = vmatmul.mubr.msk.bf16.vlgmr.msra.gmra.mrb[32].mxu0 %vm742_vm2, %v971_v27 }
 0x30a   :  { %2272 = vmatpush3.bf16.msra.mxu0 %v1072_v29  ;;  %2273 = vmatprep.mubr.msk.bf16.mxu0 %vm2465_vm0, %v2464_v1 }
 0x30b   :  { %v972_v33 = vpack.c.bf16 %v968_v31, %v968_v31  ;;  %2283 = vmatprep.subr.bf16.mxu0 %v2464_v1 }
 0x30c   :  { %v2421_v34 = vpop.eup %2420 }
 0x30d   :  { %v969_v37 = vmul.f32 %v2421_v34, %v2413_v15  ;;  %2268 = vmatmul.mubr.msk.bf16.vlgmr.msra.gmra.mrb[32].mxu1 %vm742_vm2, %v972_v33 }
 0x30e   :  { %2278 = vmatpush3.bf16.msra.mxu1 %v1118_v35  ;;  %2279 = vmatprep.mubr.msk.bf16.mxu1 %vm2465_vm0, %v2464_v1 }
 0x30f   :  { %v973_v38 = vpack.c.bf16 %v969_v37, %v969_v37  ;;  %2289 = vmatprep.subr.bf16.mxu1 %v2464_v1 }
 0x310   :  { %v2423_v40 = vpop.eup %2422 }
 0x311   :  { %v970_v41 = vmul.f32 %v2423_v40, %v2415_v18  ;;  %2274 = vmatmul.mubr.msk.bf16.vlgmr.msra.gmra.mrb[36].mxu0 %vm742_vm2, %v973_v38  ;;  %v1366_v18 = vsel %vm742_vm2, %v1361_v9, 0  ;;  %v2824_v40 = vld [vmem:[%s2888_s6] ss:$0 sm:$0xff]  ;;  %s2466_s6 = smov [#allocation2]  }
 0x312   :  { %2285 = vmatprep.mubr.msk.bf16.mxu0 %vm2465_vm0, %v2464_v1  ;;  %2284 = vmatpush3.bf16.msra.mxu0 %v2754_v47  ;;  %s1983_s12 = sshll.u32 %s2466_s6, 4  ;;  %s1984_s12 = int_to_ptr.vmem [resolvable:$true] %s1983_s12 }
 0x313   :  { %v974_v42 = vpack.c.bf16 %v970_v41, %v970_v41  ;;  %2295 = vmatprep.subr.bf16.mxu0 %v2464_v1  ;;  %s2440_s13 = scalar_lea.vmem %s1984_s12, 256  ;;  %p2445_p1 = scmp.lt.s32.totalorder %s1984_s12, %s1984_s12 }
 0x314   :  { %p2441_p0 = scmp.ne.s32.totalorder %s1984_s12, %s2440_s13  ;;  %p2446_p2 = scmp.lt.s32.totalorder %s2440_s13, %s2440_s13 }
 0x315   :  { %2280 = vmatmul.mubr.msk.bf16.vlgmr.msra.gmra.mrb[36].mxu1 %vm742_vm2, %v974_v42 }
 0x316   :  { %2291 = vmatprep.mubr.msk.bf16.mxu1 %vm2465_vm0, %v2464_v1  ;;  %2290 = vmatpush3.bf16.msra.mxu1 %v2747_v44  ;;  %p2447_p3 = por %p2446_p2, %p2445_p1 }
 0x317   :  { %2301 = vmatprep.subr.bf16.mxu1 %v2464_v1 }
 0x318   :  { %p2448_p4 = pnand %p2447_p3, %p2441_p0 }
 0x3dc   :  { %v1016_v50 = vpop.f32.mrb[32].mxu0 }
 0x3dd   :  { %v1160_v51 = vpack.c.bf16 %v1016_v50, %v1016_v50  ;;  %v2263_v52 = vpop.f32.mrb[33].mxu0 }
 0x3de   :  { %v1019_v54 = vpop.f32.mrb[34].mxu0 }
 0x3df   :  { %v2264_v57 = vpop.f32.mrb[35].mxu0  ;;  %2292 = vmatmul.mubr.msk.bf16.vlgmr.msra.gmra.mrb[40].mxu1 %vm742_vm2, %v1160_v51 }
 0x3e0   :  { %v1062_v58 = vpop.f32.mrb[32].mxu1  ;;  %2302 = vmatpush3.bf16.msra.mxu1 %v2763_v53  ;;  %2303 = vmatprep.mubr.msk.bf16.mxu1 %vm2465_vm0, %v2464_v1 }
 0x3e1   :  { %v1161_v60 = vpack.c.bf16 %v1062_v58, %v1062_v58  ;;  %v2269_v61 = vpop.f32.mrb[33].mxu1  ;;  %2313 = vmatprep.subr.bf16.mxu1 %v2464_v1 }
 0x3e2   :  { %v1065_v63 = vpop.f32.mrb[34].mxu1 }
 0x3e3   :  { %v2270_v0 = vpop.f32.mrb[35].mxu1  ;;  %2286 = vmatmul.mubr.msk.bf16.vlgmr.msra.gmra.mrb[40].mxu0 %vm742_vm2, %v1161_v60 }
 0x3e4   :  { %2296 = vmatpush3.bf16.msra.mxu0 %v2773_v62  ;;  %v1108_v2 = vpop.f32.mrb[36].mxu0  ;;  %2297 = vmatprep.mubr.msk.bf16.mxu0 %vm2465_vm0, %v2464_v1 }
 0x3e5   :  { %v2275_v3 = vpop.f32.mrb[37].mxu0  ;;  %2307 = vmatprep.subr.bf16.mxu0 %v2464_v1  ;;  %v1162_v11 = vpack.c.bf16 %v1108_v2, %v1108_v2 }
 0x3e6   :  { %v1111_v4 = vpop.f32.mrb[38].mxu0 }
 0x3e7   :  { %v2276_v7 = vpop.f32.mrb[39].mxu0 }
 0x3e8   :  { %v1154_v10 = vpop.f32.mrb[36].mxu1 }
 0x3e9   :  { %v1163_v12 = vpack.c.bf16 %v1154_v10, %v1154_v10  ;;  %v2281_v13 = vpop.f32.mrb[37].mxu1 }
 0x3ea   :  { %v1157_v14 = vpop.f32.mrb[38].mxu1 }
 0x3eb   :  { %v2282_v15 = vpop.f32.mrb[39].mxu1  ;;  %2298 = vmatmul.mubr.msk.bf16.vlgmr.msra.gmra.mrb[44].mxu0 %vm742_vm2, %v1162_v11  ;;  %2304 = vmatmul.mubr.msk.bf16.vlgmr.msra.gmra.mrb[44].mxu1 %vm742_vm2, %v1163_v12 }
 0x3ec   :  { %2314 = vmatpush3.bf16.xpose.msra.mxu1 %v1416_v17  ;;  %2309 = vmatprep.mubr.msk.bf16.mxu0 %vm2465_vm0, %v2464_v1 }
 0x3ed   :  { %2308 = vmatpush3.bf16.xpose.msra.mxu0 %v1366_v18  ;;  %2315 = vmatprep.mubr.msk.bf16.mxu1 %vm2465_vm0, %v2464_v1 }
 0x3ee   :  { %2325 = vmatprep.subr.bf16.mxu1 %v2464_v1  ;;  %2319 = vmatprep.subr.bf16.mxu0 %v2464_v1 }
 0x3f3   :  { %2316 = vmatmul.mubr.msk.bf16.vlgmr.msra.gmra.mrb[48].mxu1 %vm742_vm2, %v1409_v19 }
 0x3f4   :  { %2310 = vmatmul.mubr.msk.bf16.vlgmr.msra.gmra.mrb[48].mxu0 %vm742_vm2, %v1359_v20  ;;  %2326 = vmatpush3.bf16.xpose.msra.mxu1 %v1516_v22 }
 0x3f5   :  { %2320 = vmatpush3.bf16.xpose.msra.mxu0 %v1466_v23  ;;  %2321 = vmatprep.mubr.msk.bf16.mxu0 %vm2465_vm0, %v2464_v1 }
 0x3f6   :  { %2327 = vmatprep.mubr.msk.bf16.mxu1 %vm2465_vm0, %v2464_v1  ;;  %2337 = vmatprep.subr.bf16.mxu1 %v2464_v1 }
 0x3f7   :  { %2331 = vmatprep.subr.bf16.mxu0 %v2464_v1 }
 0x3fb   :  { %2328 = vmatmul.mubr.msk.bf16.vlgmr.msra.gmra.mrb[52].mxu1 %vm742_vm2, %v1509_v5 }
 0x3fc   :  { %2322 = vmatmul.mubr.msk.bf16.vlgmr.msra.gmra.mrb[52].mxu0 %vm742_vm2, %v1459_v8  ;;  %2338 = vmatpush3.bf16.msra.mxu1 %v1660_v24 }
 0x3fd   :  { %2332 = vmatpush3.bf16.msra.mxu0 %v1612_v25  ;;  %2333 = vmatprep.mubr.msk.bf16.mxu0 %vm2465_vm0, %v2464_v1 }
 0x3fe   :  { %2339 = vmatprep.mubr.msk.bf16.mxu1 %vm2465_vm0, %v2464_v1  ;;  %2343 = vmatprep.subr.bf16.mxu0 %v2464_v1 }
 0x3ff   :  { %2349 = vmatprep.subr.bf16.mxu1 %v2464_v1 }
 0x4b2   :  { %v1250_v46 = vpop.f32.mrb[40].mxu1 }
 0x4b3   :  { %v2293_v49 = vpop.f32.mrb[41].mxu1 }
 0x4b4   :  { %v1253_v16 = vpop.f32.mrb[42].mxu1 }
 0x4b5   :  { %v2294_v21 = vpop.f32.mrb[43].mxu1 }
 0x4b6   :  { %v1204_v26 = vpop.f32.mrb[40].mxu0 }
 0x4b7   :  { %v1251_v27 = vadd.f32 %v1250_v46, %v1204_v26  ;;  %v2287_v28 = vpop.f32.mrb[41].mxu0 }
 0x4b8   :  { %v1207_v29 = vpop.f32.mrb[42].mxu0 }
 0x4b9   :  { %v2288_v31 = vpop.f32.mrb[43].mxu0 }
 0x4be   :  { %v1296_v33 = vpop.f32.mrb[44].mxu0  ;;  %v1343_v34 = vpop.f32.mrb[44].mxu1 }
 0x4bf   :  { %v1302_v35 = vadd.f32 %v1296_v33, %v1251_v27  ;;  %v2299_v37 = vpop.f32.mrb[45].mxu0  ;;  %v2305_v38 = vpop.f32.mrb[45].mxu1 }
 0x4c0   :  { %v1299_v41 = vpop.f32.mrb[46].mxu0  ;;  %v1346_v42 = vpop.f32.mrb[46].mxu1  ;;  %v1703_v37 = vrot.slane %v2713_v30, 4 }
 0x4c1   :  { %v1349_v43 = vadd.f32 %v1343_v34, %v1302_v35  ;;  %v2300_v45 = vpop.f32.mrb[47].mxu0  ;;  %v2306_v48 = vpop.f32.mrb[47].mxu1  ;;  %v1751_v34 = vrot.slane %v2715_v32, 4 }
 0x4c2   :  { %v1708_v45 = vsel %vm978_vm3, %v1703_v37, 0 }
 0x4c3   :  { %v1356_v50 = vadd.f32 %v2824_v40, %v1349_v43  ;;  %v1756_v43 = vsel %vm978_vm3, %v1751_v34, 0 }
 0x4c5   :  { %1357 = vst.msk [vmem:[#allocation2] sm:$0xff] %vm62_vm1, %v1356_v50 }
 0x4c6   :  { %v1452_v51 = vpop.f32.mrb[48].mxu1 }
 0x4c7   :  { %v1402_v52 = vpop.f32.mrb[48].mxu0  ;;  %v2317_v54 = vpop.f32.mrb[49].mxu1  ;;  %v1561_v55 = vsel %vm742_vm2, %v1452_v51, -inf }
 0x4c8   :  { %v2311_v57 = vpop.f32.mrb[49].mxu0  ;;  %1562 = vmax.xlane.f32.xlu1 %v1561_v55  ;;  %v1455_v58 = vpop.f32.mrb[50].mxu1  ;;  %v1558_v60 = vsel %vm742_vm2, %v1402_v52, -inf }
 0x4c9   :  { %1559 = vmax.xlane.f32.xlu0 %v1558_v60  ;;  %v1405_v61 = vpop.f32.mrb[50].mxu0  ;;  %v2318_v63 = vpop.f32.mrb[51].mxu1 }
 0x4ca   :  { %v2312_v0 = vpop.f32.mrb[51].mxu0 }
 0x4ce   :  { %v1552_v2 = vpop.f32.mrb[52].mxu1 }
 0x4cf   :  { %v1502_v3 = vpop.f32.mrb[52].mxu0  ;;  %v2329_v4 = vpop.f32.mrb[53].mxu1  ;;  %v1567_v6 = vsel %vm742_vm2, %v1552_v2, -inf }
 0x4d0   :  { %v2323_v7 = vpop.f32.mrb[53].mxu0  ;;  %1568 = vmax.xlane.f32.xlu1 %v1567_v6  ;;  %v1555_v9 = vpop.f32.mrb[54].mxu1  ;;  %v1564_v10 = vsel %vm742_vm2, %v1502_v3, -inf }
 0x4d1   :  { %1565 = vmax.xlane.f32.xlu0 %v1564_v10  ;;  %v1505_v11 = vpop.f32.mrb[54].mxu0  ;;  %v2330_v12 = vpop.f32.mrb[55].mxu1 }
 0x4d2   :  { %v2324_v13 = vpop.f32.mrb[55].mxu0 }
 0x555   :  { %v1563_v14 = vpop.xlane.xlu1 %1562 }
 0x556   :  { %v1571_v15 = vsub.f32 %v1452_v51, %v1563_v14  ;;  %v1560_v17 = vpop.xlane.xlu0 %1559 }
 0x557   :  { %v1570_v18 = vsub.f32 %v1402_v52, %v1560_v17 }
 0x558   :  { %v1576_v56 = vmul.f32 1.442695, %v1571_v15 }
 0x559   :  { %v1574_v59 = vmul.f32 1.442695, %v1570_v18 }
 0x55a   :  { %2424 = vpow2.f32 %v1576_v56 }
 0x55b   :  { %2426 = vpow2.f32 %v1574_v59 }
 0x55d   :  { %v1569_v19 = vpop.xlane.xlu1 %1568 }
 0x55e   :  { %v1573_v20 = vsub.f32 %v1552_v2, %v1569_v19  ;;  %v1566_v22 = vpop.xlane.xlu0 %1565 }
 0x55f   :  { %v1572_v23 = vsub.f32 %v1502_v3, %v1566_v22 }
 0x560   :  { %v1580_v36 = vmul.f32 1.442695, %v1573_v20 }
 0x561   :  { %v1578_v39 = vmul.f32 1.442695, %v1572_v23 }
 0x562   :  { %2428 = vpow2.f32 %v1580_v36 }
 0x563   :  { %2430 = vpow2.f32 %v1578_v39 }
 0x564   :  { %v2425_v5 = vpop.eup %2424 }
 0x565   :  { %v2427_v8 = vpop.eup %2426  ;;  %v1585_v24 = vsel %vm742_vm2, %v2425_v5, 0.0 }
 0x566   :  { %1586 = vadd.xlane.f32.xlu1 %v1585_v24  ;;  %v1582_v25 = vsel %vm742_vm2, %v2427_v8, 0.0 }
 0x567   :  { %1583 = vadd.xlane.f32.xlu0 %v1582_v25 }
 0x56c   :  { %v2429_v46 = vpop.eup %2428 }
 0x56d   :  { %v2431_v49 = vpop.eup %2430  ;;  %v1591_v16 = vsel %vm742_vm2, %v2429_v46, 0.0 }
 0x56e   :  { %1592 = vadd.xlane.f32.xlu1 %v1591_v16  ;;  %v1588_v21 = vsel %vm742_vm2, %v2431_v49, 0.0 }
 0x56f   :  { %1589 = vadd.xlane.f32.xlu0 %v1588_v21 }
 0x5f3   :  { %v1587_v26 = vpop.xlane.xlu1 %1586 }
 0x5f4   :  { %2432 = vrcp.f32 %v1587_v26  ;;  %v1584_v27 = vpop.xlane.xlu0 %1583 }
 0x5f5   :  { %2434 = vrcp.f32 %v1584_v27 }
 0x5fb   :  { %v1593_v28 = vpop.xlane.xlu1 %1592 }
 0x5fc   :  { %2436 = vrcp.f32 %v1593_v28  ;;  %v1590_v29 = vpop.xlane.xlu0 %1589 }
 0x5fd   :  { %2438 = vrcp.f32 %v1590_v29 }
 0x5fe   :  { %v2433_v31 = vpop.eup %2432 }
 0x5ff   :  { %v2435_v33 = vpop.eup %2434  ;;  %v1599_v35 = vmul.f32 %v2433_v31, %v2425_v5 }
 0x600   :  { %v1598_v38 = vmul.f32 %v2435_v33, %v2427_v8 }
 0x601   :  { %v1603_v41 = vpack.c.bf16 %v1599_v35, %v1599_v35 }
 0x602   :  { %v1602_v42 = vpack.c.bf16 %v1598_v38, %v1598_v38 }
 0x603   :  { %2340 = vmatmul.mubr.msk.bf16.vlgmr.msra.gmra.mrb[56].mxu1 %vm742_vm2, %v1603_v41 }
 0x604   :  { %2334 = vmatmul.mubr.msk.bf16.vlgmr.msra.gmra.mrb[56].mxu0 %vm742_vm2, %v1602_v42  ;;  %2350 = vmatpush3.bf16.msra.mxu1 %v1756_v43 }
 0x605   :  { %2344 = vmatpush3.bf16.msra.mxu0 %v1708_v45  ;;  %2345 = vmatprep.mubr.msk.bf16.mxu0 %vm2465_vm0, %v2464_v1 }
 0x606   :  { %v2437_v32 = vpop.eup %2436  ;;  %2351 = vmatprep.mubr.msk.bf16.mxu1 %vm2465_vm0, %v2464_v1  ;;  %2355 = vmatprep.subr.bf16.mxu0 %v2464_v1 }
 0x607   :  { %v2439_v30 = vpop.eup %2438  ;;  %v1601_v48 = vmul.f32 %v2437_v32, %v2429_v46  ;;  %2361 = vmatprep.subr.bf16.mxu1 %v2464_v1 }
 0x608   :  { %v1600_v50 = vmul.f32 %v2439_v30, %v2431_v49 }
 0x609   :  { %v1605_v51 = vpack.c.bf16 %v1601_v48, %v1601_v48 }
 0x60a   :  { %v1604_v52 = vpack.c.bf16 %v1600_v50, %v1600_v50 }
 0x60b   :  { %2352 = vmatmul.mubr.msk.bf16.vlgmr.msra.gmra.mrb[60].mxu1 %vm742_vm2, %v1605_v51 }
 0x60c   :  { %2346 = vmatmul.mubr.msk.bf16.vlgmr.msra.gmra.mrb[60].mxu0 %vm742_vm2, %v1604_v52  ;;  %2362 = vmatpush3.bf16.msra.mxu1 %v2747_v44 }
 0x60d   :  { %2356 = vmatpush3.bf16.msra.mxu0 %v2754_v47  ;;  %2357 = vmatprep.mubr.msk.bf16.mxu0 %vm2465_vm0, %v2464_v1 }
 0x60e   :  { %2363 = vmatprep.mubr.msk.bf16.mxu1 %vm2465_vm0, %v2464_v1  ;;  %2367 = vmatprep.subr.bf16.mxu0 %v2464_v1 }
 0x60f   :  { %2373 = vmatprep.subr.bf16.mxu1 %v2464_v1 }
 0x6d6   :  { %v1696_v54 = vpop.f32.mrb[56].mxu1 }
 0x6d7   :  { %v1648_v55 = vpop.f32.mrb[56].mxu0  ;;  %v1799_v57 = vpack.c.bf16 %v1696_v54, %v1696_v54  ;;  %v2341_v58 = vpop.f32.mrb[57].mxu1 }
 0x6d8   :  { %v1798_v60 = vpack.c.bf16 %v1648_v55, %v1648_v55  ;;  %v2335_v61 = vpop.f32.mrb[57].mxu0  ;;  %v1699_v63 = vpop.f32.mrb[58].mxu1 }
 0x6d9   :  { %v1651_v44 = vpop.f32.mrb[58].mxu0  ;;  %v2342_v0 = vpop.f32.mrb[59].mxu1  ;;  %2358 = vmatmul.mubr.msk.bf16.vlgmr.msra.gmra.mrb[64].mxu0 %vm742_vm2, %v1799_v57 }
 0x6da   :  { %v2336_v47 = vpop.f32.mrb[59].mxu0  ;;  %2364 = vmatmul.mubr.msk.bf16.vlgmr.msra.gmra.mrb[64].mxu1 %vm742_vm2, %v1798_v60  ;;  %2368 = vmatpush3.bf16.msra.mxu0 %v2773_v62 }
 0x6db   :  { %2374 = vmatpush3.bf16.msra.mxu1 %v2763_v53  ;;  %2369 = vmatprep.mubr.msk.bf16.mxu0 %vm2465_vm0, %v2464_v1 }
 0x6dc   :  { %2375 = vmatprep.mubr.msk.bf16.mxu1 %vm2465_vm0, %v2464_v1 }
 0x6de   :  { %v1792_v2 = vpop.f32.mrb[60].mxu1 }
 0x6df   :  { %v1744_v3 = vpop.f32.mrb[60].mxu0  ;;  %v1801_v4 = vpack.c.bf16 %v1792_v2, %v1792_v2  ;;  %v2353_v6 = vpop.f32.mrb[61].mxu1 }
 0x6e0   :  { %v1800_v7 = vpack.c.bf16 %v1744_v3, %v1744_v3  ;;  %v2347_v9 = vpop.f32.mrb[61].mxu0  ;;  %v1795_v10 = vpop.f32.mrb[62].mxu1 }
 0x6e1   :  { %v1747_v11 = vpop.f32.mrb[62].mxu0  ;;  %v2354_v12 = vpop.f32.mrb[63].mxu1 }
 0x6e2   :  { %v2348_v13 = vpop.f32.mrb[63].mxu0  ;;  %2370 = vmatmul.mubr.msk.bf16.vlgmr.msra.gmra.mrb[68].mxu0 %vm742_vm2, %v1800_v7  ;;  %2376 = vmatmul.mubr.msk.bf16.vlgmr.msra.gmra.mrb[68].mxu1 %vm742_vm2, %v1801_v4 }
 0x7ac   :  { %v1839_v53 = vpop.f32.mrb[64].mxu0 }
 0x7ad   :  { %v1882_v62 = vpop.f32.mrb[64].mxu1  ;;  %v2359_v14 = vpop.f32.mrb[65].mxu0 }
 0x7ae   :  { %v1883_v15 = vadd.f32 %v1882_v62, %v1839_v53  ;;  %v2365_v17 = vpop.f32.mrb[65].mxu1  ;;  %v1842_v1 = vpop.f32.mrb[66].mxu0 }
 0x7af   :  { %v1885_v18 = vpop.f32.mrb[66].mxu1  ;;  %v2360_v56 = vpop.f32.mrb[67].mxu0 }
 0x7b0   :  { %v2366_v59 = vpop.f32.mrb[67].mxu1 }
 0x7b5   :  { %v1925_v19 = vpop.f32.mrb[68].mxu0  ;;  %v1969_v20 = vpop.f32.mrb[68].mxu1 }
 0x7b6   :  { %v1931_v22 = vadd.f32 %v1925_v19, %v1883_v15  ;;  %v2371_v23 = vpop.f32.mrb[69].mxu0  ;;  %v2377_v36 = vpop.f32.mrb[69].mxu1 }
 0x7b7   :  { %v1928_v39 = vpop.f32.mrb[70].mxu0  ;;  %v1972_v5 = vpop.f32.mrb[70].mxu1 }
 0x7b8   :  { %v1975_v8 = vadd.f32 %v1969_v20, %v1931_v22  ;;  %v2372_v24 = vpop.f32.mrb[71].mxu0  ;;  %v2378_v25 = vpop.f32.mrb[71].mxu1 }
 0x7ba   :  { %v1976_v46 = vadd.f32 %v2824_v40, %v1975_v8 }
 0x7bc   :  { %1977 = vst.msk [vmem:[#allocation2 + $0x8] sm:$0xff] %vm62_vm1, %v1976_v46 }
 0x7bd   :  { %2451 = shalt.err (!%p2448_p4)
}
 0x7be   :  { %s2452_s16 = scalar_lea.hbm %s2889_s7, 256 }
 0x7bf   :  { %p2453_p5 = scmp.ne.s32.totalorder %s2889_s7, %s2452_s16  ;;  %p2456_p6 = scmp.lt.u32.totalorder %s2452_s16, %s2889_s7 }
 0x7c1   :  { %p2458_p7 = pnand %p2456_p6, %p2453_p5 }
 0x7c3   :  { %2461 = shalt.err (!%p2458_p7)
}
 0x7c4   :  { %s2467_s19 = smov 128   ;;  %s2468_s20 = smov 8  }
 0x7c5   :  { %1989 = dma.vmem_to_hbm [thread:$0]  %s1984_s12, 256, %s2889_s7, [#allocation3], %s2467_s19, %s2467_s19, %s2468_s20  }
 0x7c6   :  { %2462 = dma.done.wait [#allocation3], 256  }
 0x7c7   :  { %2463 = vsyncadd [#allocation3], 4294967040 }
 0x7c8   :  { %1993 = vsyncpa [#allocation3], 1 }

</bundles_post_ra>
